<compile_context>
chip_gen: v7x
topology: tpu7x:2x2x1
jax: 0.10.0
libtpu: 0.0.40
codegen_flags: <defaults>
</compile_context>

<pallas_src>
import jax
import jax.numpy as jnp
from jax.experimental import pallas as pl
from jax.experimental.pallas import tpu as pltpu


# ----------------------------------------------------------------------------
# Fused kernel: backbone chain + global-avg-pool + condition head
# ----------------------------------------------------------------------------
def _round_up(x, m):
    return ((x + m - 1) // m) * m


def _make_fused_kernel(num_layers, inv_hw):
    """Builds the fused kernel for a fixed number of backbone layers.

    Ref layout (positional):
      [0]                      x tile            (TILE_S, CP_in)
      [1+2l], [2+2l]           layer-l weight (CP_l, CP_{l+1}), bias (1, CP_{l+1})
      [1+2L], [2+2L]           head weight (CP_L, KP), head bias (1, KP)
      [3+2L .. 3+3L)           encoding outputs  (TILE_S, CP_{l+1})
      [3+3L]                   logits output     (1, KP)
      [4+3L]                   pooled-sum scratch (1, CP_L)  [VMEM]
    """

    def kernel(*refs):
        x_ref = refs[0]
        w_refs = [refs[1 + 2 * l] for l in range(num_layers)]
        b_refs = [refs[2 + 2 * l] for l in range(num_layers)]
        head_w_ref = refs[1 + 2 * num_layers]
        head_b_ref = refs[2 + 2 * num_layers]
        enc_refs = [refs[3 + 2 * num_layers + l] for l in range(num_layers)]
        logits_ref = refs[3 + 3 * num_layers]
        pooled_ref = refs[4 + 3 * num_layers]

        s = pl.program_id(1)

        # Backbone chain: activation tile stays resident across layers.
        act = x_ref[...]                                        # (TILE_S, CP_in)
        for l in range(num_layers):
            y = jnp.dot(act, w_refs[l][...],
                        preferred_element_type=jnp.float32)
            y = jnp.maximum(y + b_refs[l][...], 0.0)
            enc_refs[l][...] = y.astype(enc_refs[l].dtype)
            act = y

        # Global-average-pool accumulation for the ConditionHead.
        @pl.when(s == 0)
        def _init():
            pooled_ref[...] = jnp.zeros_like(pooled_ref)

        pooled_ref[...] += jnp.sum(act, axis=0, keepdims=True)

        # Finalize: mean over HW, then the tiny (1,C)@(C,K) head matmul + bias.
        @pl.when(s == pl.num_programs(1) - 1)
        def _finalize():
            mean = pooled_ref[...] * inv_hw                     # (1, CP_L)
            logits = jnp.dot(mean, head_w_ref[...],
                             preferred_element_type=jnp.float32)
            logits_ref[...] = logits + head_b_ref[...]

    return kernel


def fused_backbone_and_head(x_nchw, backbone_params, head_w, head_b, *,
                            tile_s=128):
    """Runs the whole backbone + ConditionHead in one gridded pallas_call.

    x_nchw: (N, Cin, H, W)
    backbone_params: list of (w: (Cin_l, Cout_l), b: (Cout_l,))
    head_w: (Cout_last, K), head_b: (K,)
    Returns (encodings list of NCHW arrays, logits (N, K)).
    """
    n, cin, h, wdim = x_nchw.shape
    hw = h * wdim
    if tile_s % 8 != 0 or hw % tile_s != 0:
        tile_s = hw  # fallback: whole spatial extent as one tile
    num_layers = len(backbone_params)
    couts = [w.shape[1] for w, _ in backbone_params]
    k = head_w.shape[1]

    # Lane-dense (multiple-of-128) padded channel widths.
    cps = [_round_up(max(c, 128), 128) for c in [cin] + couts]
    kp = _round_up(max(k, 128), 128)

    # Single layout change: NCHW -> channels-last (N, HW, Cin), zero-pad lanes.
    x_cl = jnp.transpose(x_nchw, (0, 2, 3, 1)).reshape(n, hw, cin)
    x_cl = jnp.pad(x_cl, ((0, 0), (0, 0), (0, cps[0] - cin)))

    # Zero-pad weights / biases (padded channels stay exactly 0 through ReLU).
    flat_wb = []
    c_prev = cin
    for l, (wl, bl) in enumerate(backbone_params):
        cout = couts[l]
        flat_wb.append(jnp.pad(wl, ((0, cps[l] - c_prev), (0, cps[l + 1] - cout))))
        flat_wb.append(jnp.pad(bl, (0, cps[l + 1] - cout)).reshape(1, cps[l + 1]))
        c_prev = cout
    head_w_p = jnp.pad(head_w, ((0, cps[-1] - c_prev), (0, kp - k)))
    head_b_p = jnp.pad(head_b, (0, kp - k)).reshape(1, kp)

    grid = (n, hw // tile_s)

    in_specs = [pl.BlockSpec((None, tile_s, cps[0]), lambda nn, ss: (nn, ss, 0))]
    for l in range(num_layers):
        in_specs.append(pl.BlockSpec((cps[l], cps[l + 1]), lambda nn, ss: (0, 0)))
        in_specs.append(pl.BlockSpec((1, cps[l + 1]), lambda nn, ss: (0, 0)))
    in_specs.append(pl.BlockSpec((cps[-1], kp), lambda nn, ss: (0, 0)))
    in_specs.append(pl.BlockSpec((1, kp), lambda nn, ss: (0, 0)))

    out_shapes = tuple(
        jax.ShapeDtypeStruct((n, hw, cps[l + 1]), jnp.float32)
        for l in range(num_layers)
    ) + (jax.ShapeDtypeStruct((n, 1, kp), jnp.float32),)

    out_specs = [
        pl.BlockSpec((None, tile_s, cps[l + 1]), lambda nn, ss: (nn, ss, 0))
        for l in range(num_layers)
    ] + [pl.BlockSpec((None, 1, kp), lambda nn, ss: (nn, 0, 0))]

    kernel = _make_fused_kernel(num_layers, 1.0 / float(hw))

    outs = pl.pallas_call(
        kernel,
        out_shape=out_shapes,
        grid_spec=pltpu.PrefetchScalarGridSpec(
            num_scalar_prefetch=0,
            grid=grid,
            in_specs=in_specs,
            out_specs=out_specs,
            scratch_shapes=[pltpu.VMEM((1, cps[-1]), jnp.float32)],
        ),
        compiler_params=pltpu.CompilerParams(
            dimension_semantics=("parallel", "arbitrary"),
        ),
    )(x_cl, *flat_wb, head_w_p, head_b_p)

    enc_padded = outs[:num_layers]
    logits_padded = outs[num_layers]

    # Output formatting only: slice padded lanes, restore NCHW for encodings.
    encodings = [
        jnp.transpose(
            enc_padded[l][:, :, :couts[l]].reshape(n, h, wdim, couts[l]),
            (0, 3, 1, 2),
        )
        for l in range(num_layers)
    ]
    logits = logits_padded[:, 0, :k]
    return encodings, logits


# ----------------------------------------------------------------------------
# Model
# ----------------------------------------------------------------------------
def init_params(key, in_channels, backbone_channels, n_classes):
    """Deterministic parameter init (synthetic stand-in for pretrained weights)."""
    params = {"backbone": []}
    cin = in_channels
    for cout in backbone_channels:
        key, kw, kb = jax.random.split(key, 3)
        w = jax.random.normal(kw, (cin, cout), jnp.float32) * (1.0 / jnp.sqrt(cin))
        b = jax.random.normal(kb, (cout,), jnp.float32) * 0.01
        params["backbone"].append((w, b))
        cin = cout
    key, kw, kb = jax.random.split(key, 3)
    params["head_w"] = jax.random.normal(kw, (cin, n_classes), jnp.float32) * (
        1.0 / jnp.sqrt(cin)
    )
    params["head_b"] = jax.random.normal(kb, (n_classes,), jnp.float32) * 0.01
    return params


def model_forward(params, x, y=None):
    """Mirrors Model.forward(x, y) -> (detections, encoding, condition_logits)."""
    encoding, cond_logits = fused_backbone_and_head(
        x, params["backbone"], params["head_w"], params["head_b"]
    )
    # TODO(synk): detection branch self.model(x, y) (FCOS/SSD) not implemented.
    detections = None
    return detections, encoding, cond_logits


# ----------------------------------------------------------------------------
# Main
# ----------------------------------------------------------------------------
if __name__ == "__main__":
    key = jax.random.PRNGKey(0)
    key, kx = jax.random.split(key)

    # Small shapes consistent with the forward (NCHW image input).
    N, C, H, W = 2, 4, 16, 16
    backbone_channels = (16, 32)   # synthetic backbone; backbone_out = 32
    n_condition_classes = 5

    x = jax.random.normal(kx, (N, C, H, W), jnp.float32)
    y = None  # detection targets are unused in the translated path

    params = init_params(key, C, backbone_channels, n_condition_classes)

    detections, encoding, cond_logits = model_forward(params, x, y)
    cond_logits = jax.block_until_ready(cond_logits)
    encoding = [jax.block_until_ready(e) for e in encoding]

    # Lightweight correctness check against a pure-JAX reference.
    ref_act = x
    for w, b in params["backbone"]:
        ref_act = jnp.maximum(
            jnp.einsum("nchw,ck->nkhw", ref_act, w) + b[None, :, None, None], 0.0
        )
    ref_logits = ref_act.mean(axis=(2, 3)) @ params["head_w"] + params["head_b"]

    assert cond_logits.shape == (N, n_condition_classes)
    assert encoding[-1].shape == (N, backbone_channels[-1], H, W)
    assert jnp.allclose(encoding[-1], ref_act, atol=1e-4, rtol=1e-4)
    assert jnp.allclose(cond_logits, ref_logits, atol=1e-4, rtol=1e-4)

    print("KERNEL_OK")
</pallas_src>

<mosaic_0001>
module attributes {stable_mosaic.version = 11 : i64} {
  func.func @kernel(%arg0: i32, %arg1: i32, %arg2: memref<1x128x128xf32, #tpu.memory_space<vmem>>, %arg3: memref<128x128xf32, #tpu.memory_space<vmem>>, %arg4: memref<1x128xf32, #tpu.memory_space<vmem>>, %arg5: memref<128x128xf32, #tpu.memory_space<vmem>>, %arg6: memref<1x128xf32, #tpu.memory_space<vmem>>, %arg7: memref<128x128xf32, #tpu.memory_space<vmem>>, %arg8: memref<1x128xf32, #tpu.memory_space<vmem>>, %arg9: memref<1x128x128xf32, #tpu.memory_space<vmem>>, %arg10: memref<1x128x128xf32, #tpu.memory_space<vmem>>, %arg11: memref<1x1x128xf32, #tpu.memory_space<vmem>>, %arg12: memref<1x128xf32, #tpu.memory_space<vmem>>) attributes {dimension_semantics = [#tpu.dimension_semantics<parallel>, #tpu.dimension_semantics<arbitrary>], iteration_bounds = array<i64: 2, 2>, scalar_prefetch = 0 : i64, scratch_operands = 1 : i64, tpu.core_type = #tpu.core_type<tc>, window_params = [{transform_indices = @transform_0, window_bounds = array<i64: 1, 128, 128>}, {pipeline_mode = #tpu.pipeline_mode<synchronous>, transform_indices = @transform_1, window_bounds = array<i64: 128, 128>}, {pipeline_mode = #tpu.pipeline_mode<synchronous>, transform_indices = @transform_2, window_bounds = array<i64: 1, 128>}, {pipeline_mode = #tpu.pipeline_mode<synchronous>, transform_indices = @transform_3, window_bounds = array<i64: 128, 128>}, {pipeline_mode = #tpu.pipeline_mode<synchronous>, transform_indices = @transform_4, window_bounds = array<i64: 1, 128>}, {pipeline_mode = #tpu.pipeline_mode<synchronous>, transform_indices = @transform_5, window_bounds = array<i64: 128, 128>}, {pipeline_mode = #tpu.pipeline_mode<synchronous>, transform_indices = @transform_6, window_bounds = array<i64: 1, 128>}, {transform_indices = @transform_7, window_bounds = array<i64: 1, 128, 128>}, {transform_indices = @transform_8, window_bounds = array<i64: 1, 128, 128>}, {transform_indices = @transform_9, window_bounds = array<i64: 1, 1, 128>}]} {
    %c0 = arith.constant 0 : index
    %c0_0 = arith.constant 0 : index
    %c0_1 = arith.constant 0 : index
    %0 = vector.load %arg2[%c0, %c0_0, %c0_1] : memref<1x128x128xf32, #tpu.memory_space<vmem>>, vector<1x128x128xf32>
    %1 = vector.shape_cast %0 : vector<1x128x128xf32> to vector<128x128xf32>
    %c0_2 = arith.constant 0 : index
    %c0_3 = arith.constant 0 : index
    %2 = vector.load %arg3[%c0_2, %c0_3] : memref<128x128xf32, #tpu.memory_space<vmem>>, vector<128x128xf32>
    %cst = arith.constant dense<0.000000e+00> : vector<128x128xf32>
    %3 = tpu.matmul %1, %2, %cst {dimension_numbers = #tpu.dot_dimension_numbers<[1], [0], [0], [1], [0, 0, 1, 1], [], []>} : vector<128x128xf32>, vector<128x128xf32>, vector<128x128xf32> -> vector<128x128xf32>
    %c0_4 = arith.constant 0 : index
    %c0_5 = arith.constant 0 : index
    %4 = vector.load %arg4[%c0_4, %c0_5] : memref<1x128xf32, #tpu.memory_space<vmem>>, vector<1x128xf32>
    %5 = vector.broadcast %4 : vector<1x128xf32> to vector<128x128xf32>
    %6 = arith.addf %3, %5 : vector<128x128xf32>
    %cst_6 = arith.constant 0.000000e+00 : f32
    %7 = vector.broadcast %cst_6 : f32 to vector<128x128xf32>
    %8 = arith.maximumf %6, %7 : vector<128x128xf32>
    %c0_7 = arith.constant 0 : index
    %c0_8 = arith.constant 0 : index
    %c0_9 = arith.constant 0 : index
    %9 = vector.load %arg9[%c0_7, %c0_8, %c0_9] : memref<1x128x128xf32, #tpu.memory_space<vmem>>, vector<1x128x128xf32>
    %10 = vector.shape_cast %9 : vector<1x128x128xf32> to vector<128x128xf32>
    %11 = vector.shape_cast %8 : vector<128x128xf32> to vector<1x128x128xf32>
    tpu.vector_store %arg9[%c0_7, %c0_8, %c0_9], %11 {strides = array<i32>} : memref<1x128x128xf32, #tpu.memory_space<vmem>>, vector<1x128x128xf32>,
    %c0_10 = arith.constant 0 : index
    %c0_11 = arith.constant 0 : index
    %12 = vector.load %arg5[%c0_10, %c0_11] : memref<128x128xf32, #tpu.memory_space<vmem>>, vector<128x128xf32>
    %cst_12 = arith.constant dense<0.000000e+00> : vector<128x128xf32>
    %13 = tpu.matmul %8, %12, %cst_12 {dimension_numbers = #tpu.dot_dimension_numbers<[1], [0], [0], [1], [0, 0, 1, 1], [], []>} : vector<128x128xf32>, vector<128x128xf32>, vector<128x128xf32> -> vector<128x128xf32>
    %c0_13 = arith.constant 0 : index
    %c0_14 = arith.constant 0 : index
    %14 = vector.load %arg6[%c0_13, %c0_14] : memref<1x128xf32, #tpu.memory_space<vmem>>, vector<1x128xf32>
    %15 = vector.broadcast %14 : vector<1x128xf32> to vector<128x128xf32>
    %16 = arith.addf %13, %15 : vector<128x128xf32>
    %cst_15 = arith.constant 0.000000e+00 : f32
    %17 = vector.broadcast %cst_15 : f32 to vector<128x128xf32>
    %18 = arith.maximumf %16, %17 : vector<128x128xf32>
    %c0_16 = arith.constant 0 : index
    %c0_17 = arith.constant 0 : index
    %c0_18 = arith.constant 0 : index
    %19 = vector.load %arg10[%c0_16, %c0_17, %c0_18] : memref<1x128x128xf32, #tpu.memory_space<vmem>>, vector<1x128x128xf32>
    %20 = vector.shape_cast %19 : vector<1x128x128xf32> to vector<128x128xf32>
    %21 = vector.shape_cast %18 : vector<128x128xf32> to vector<1x128x128xf32>
    tpu.vector_store %arg10[%c0_16, %c0_17, %c0_18], %21 {strides = array<i32>} : memref<1x128x128xf32, #tpu.memory_space<vmem>>, vector<1x128x128xf32>,
    %c0_i32 = arith.constant 0 : i32
    %22 = arith.cmpi eq, %arg1, %c0_i32 : i32
    %23 = arith.extui %22 : i1 to i32
    %c0_i32_19 = arith.constant 0 : i32
    %24 = arith.cmpi ne, %23, %c0_i32_19 : i32
    scf.if %24 {
      %cst_26 = arith.constant 0.000000e+00 : f32
      %33 = vector.broadcast %cst_26 : f32 to vector<1x128xf32>
      %c0_27 = arith.constant 0 : index
      %c0_28 = arith.constant 0 : index
      %34 = vector.load %arg12[%c0_27, %c0_28] : memref<1x128xf32, #tpu.memory_space<vmem>>, vector<1x128xf32>
      tpu.vector_store %arg12[%c0_27, %c0_28], %33 {strides = array<i32>} : memref<1x128xf32, #tpu.memory_space<vmem>>, vector<1x128xf32>,
    } else {
    }
    %c0_20 = arith.constant 0 : index
    %c0_21 = arith.constant 0 : index
    %25 = vector.load %arg12[%c0_20, %c0_21] : memref<1x128xf32, #tpu.memory_space<vmem>>, vector<1x128xf32>
    %cst_22 = arith.constant dense<0.000000e+00> : vector<128xf32>
    %26 = vector.multi_reduction <add>, %18, %cst_22 [0] : vector<128x128xf32> to vector<128xf32>
    %27 = vector.shape_cast %26 : vector<128xf32> to vector<1x128xf32>
    %28 = arith.addf %25, %27 : vector<1x128xf32>
    %c0_23 = arith.constant 0 : index
    %c0_24 = arith.constant 0 : index
    %29 = vector.load %arg12[%c0_23, %c0_24] : memref<1x128xf32, #tpu.memory_space<vmem>>, vector<1x128xf32>
    tpu.vector_store %arg12[%c0_23, %c0_24], %28 {strides = array<i32>} : memref<1x128xf32, #tpu.memory_space<vmem>>, vector<1x128xf32>,
    %c1_i32 = arith.constant 1 : i32
    %30 = arith.cmpi eq, %arg1, %c1_i32 : i32
    %31 = arith.extui %30 : i1 to i32
    %c0_i32_25 = arith.constant 0 : i32
    %32 = arith.cmpi ne, %31, %c0_i32_25 : i32
    scf.if %32 {
      %c0_26 = arith.constant 0 : index
      %c0_27 = arith.constant 0 : index
      %33 = vector.load %arg12[%c0_26, %c0_27] : memref<1x128xf32, #tpu.memory_space<vmem>>, vector<1x128xf32>
      %cst_28 = arith.constant 3.906250e-03 : f32
      %34 = vector.broadcast %cst_28 : f32 to vector<1x128xf32>
      %35 = arith.mulf %33, %34 : vector<1x128xf32>
      %c0_29 = arith.constant 0 : index
      %c0_30 = arith.constant 0 : index
      %36 = vector.load %arg7[%c0_29, %c0_30] : memref<128x128xf32, #tpu.memory_space<vmem>>, vector<128x128xf32>
      %cst_31 = arith.constant dense<0.000000e+00> : vector<1x128xf32>
      %37 = tpu.matmul %35, %36, %cst_31 {dimension_numbers = #tpu.dot_dimension_numbers<[1], [0], [0], [1], [0, 0, 1, 1], [], []>} : vector<1x128xf32>, vector<128x128xf32>, vector<1x128xf32> -> vector<1x128xf32>
      %c0_32 = arith.constant 0 : index
      %c0_33 = arith.constant 0 : index
      %38 = vector.load %arg8[%c0_32, %c0_33] : memref<1x128xf32, #tpu.memory_space<vmem>>, vector<1x128xf32>
      %39 = arith.addf %37, %38 : vector<1x128xf32>
      %c0_34 = arith.constant 0 : index
      %c0_35 = arith.constant 0 : index
      %c0_36 = arith.constant 0 : index
      %40 = vector.load %arg11[%c0_34, %c0_35, %c0_36] : memref<1x1x128xf32, #tpu.memory_space<vmem>>, vector<1x1x128xf32>
      %41 = vector.shape_cast %40 : vector<1x1x128xf32> to vector<1x128xf32>
      %42 = vector.shape_cast %39 : vector<1x128xf32> to vector<1x1x128xf32>
      tpu.vector_store %arg11[%c0_34, %c0_35, %c0_36], %42 {strides = array<i32>} : memref<1x1x128xf32, #tpu.memory_space<vmem>>, vector<1x1x128xf32>,
    } else {
    }
    return
  }
  func.func @transform_0(%arg0: i32, %arg1: i32) -> (i32, i32, i32) {
    %c0_i32 = arith.constant 0 : i32
    %c0_i32_0 = arith.constant 0 : i32
    return %arg0, %arg1, %c0_i32 : i32, i32, i32
  }
  func.func @transform_1(%arg0: i32, %arg1: i32) -> (i32, i32) {
    %c0_i32 = arith.constant 0 : i32
    %c0_i32_0 = arith.constant 0 : i32
    %c0_i32_1 = arith.constant 0 : i32
    return %c0_i32, %c0_i32_0 : i32, i32
  }
  func.func @transform_2(%arg0: i32, %arg1: i32) -> (i32, i32) {
    %c0_i32 = arith.constant 0 : i32
    %c0_i32_0 = arith.constant 0 : i32
    %c0_i32_1 = arith.constant 0 : i32
    return %c0_i32, %c0_i32_0 : i32, i32
  }
  func.func @transform_3(%arg0: i32, %arg1: i32) -> (i32, i32) {
    %c0_i32 = arith.constant 0 : i32
    %c0_i32_0 = arith.constant 0 : i32
    %c0_i32_1 = arith.constant 0 : i32
    return %c0_i32, %c0_i32_0 : i32, i32
  }
  func.func @transform_4(%arg0: i32, %arg1: i32) -> (i32, i32) {
    %c0_i32 = arith.constant 0 : i32
    %c0_i32_0 = arith.constant 0 : i32
    %c0_i32_1 = arith.constant 0 : i32
    return %c0_i32, %c0_i32_0 : i32, i32
  }
  func.func @transform_5(%arg0: i32, %arg1: i32) -> (i32, i32) {
    %c0_i32 = arith.constant 0 : i32
    %c0_i32_0 = arith.constant 0 : i32
    %c0_i32_1 = arith.constant 0 : i32
    return %c0_i32, %c0_i32_0 : i32, i32
  }
  func.func @transform_6(%arg0: i32, %arg1: i32) -> (i32, i32) {
    %c0_i32 = arith.constant 0 : i32
    %c0_i32_0 = arith.constant 0 : i32
    %c0_i32_1 = arith.constant 0 : i32
    return %c0_i32, %c0_i32_0 : i32, i32
  }
  func.func @transform_7(%arg0: i32, %arg1: i32) -> (i32, i32, i32) {
    %c0_i32 = arith.constant 0 : i32
    %c0_i32_0 = arith.constant 0 : i32
    return %arg0, %arg1, %c0_i32 : i32, i32, i32
  }
  func.func @transform_8(%arg0: i32, %arg1: i32) -> (i32, i32, i32) {
    %c0_i32 = arith.constant 0 : i32
    %c0_i32_0 = arith.constant 0 : i32
    return %arg0, %arg1, %c0_i32 : i32, i32, i32
  }
  func.func @transform_9(%arg0: i32, %arg1: i32) -> (i32, i32, i32) {
    %c0_i32 = arith.constant 0 : i32
    %c0_i32_0 = arith.constant 0 : i32
    %c0_i32_1 = arith.constant 0 : i32
    return %arg0, %c0_i32, %c0_i32_0 : i32, i32, i32
  }
}

</mosaic_0001>

<bundles_post_ra>
// kernel: tpu_custom_call.1
= control target key start
LH: loop header
LB: loop body
LE: loop exit
PB: predicated region body
PF: predicated region fallthrough
CT: control target
= control target key end

     0   :  { %s2622_s0 = inlined_call_operand.hbm [shape: f32[2,256,128], index: 0, kind: input, shape index: {}]   ;;  %s2623_s1 = inlined_call_operand.hbm [shape: f32[128,128], index: 1, kind: input, shape index: {}]   ;;  %s2624_s2 = inlined_call_operand.vmem [shape: f32[1,128], index: 2, kind: input, shape index: {}]   ;;  %s2625_s3 = inlined_call_operand.hbm [shape: f32[128,128], index: 3, kind: input, shape index: {}]   ;;  %s2626_s4 = inlined_call_operand.vmem [shape: f32[1,128], index: 4, kind: input, shape index: {}]   ;;  %s2627_s5 = inlined_call_operand.hbm [shape: f32[128,128], index: 5, kind: input, shape index: {}]   ;;  %s2628_s6 = inlined_call_operand.vmem [shape: f32[1,128], index: 6, kind: input, shape index: {}]   ;;  %s2629_s7 = inlined_call_operand.hbm [shape: f32[2,256,128], index: 7, kind: output, shape index: {0}]   ;;  %s2630_s8 = inlined_call_operand.hbm [shape: f32[2,256,128], index: 8, kind: output, shape index: {1}]   ;;  %s2631_s9 = inlined_call_operand.hbm [shape: f32[2,1,128], index: 9, kind: output, shape index: {2}]  }
   0x1   :  { %2651 = sst [smem:[#allocation29_spill]] %s2622_s0 }
   0x2   :  { %2652 = sst [smem:[#allocation30_spill]] %s2623_s1 }
   0x3   :  { %2653 = sst [smem:[#allocation31_spill]] %s2624_s2 }
   0x4   :  { %2654 = sst [smem:[#allocation32_spill]] %s2625_s3 }
   0x5   :  { %2655 = sst [smem:[#allocation33_spill]] %s2627_s5 }
   0x6   :  { %2656 = sst [smem:[#allocation34_spill]] %s2628_s6 }
   0x7   :  { %2657 = sst [smem:[#allocation35_spill]] %s2629_s7 }
   0x8   :  { %2658 = sst [smem:[#allocation36_spill]] %s2630_s8 }
   0x9   :  { %2659 = sst [smem:[#allocation37_spill]] %s2631_s9 }
   0xa   :  { %15 = vsyncpa [#allocation4], 0 }
   0xb   :  { %17 = vsyncpa [#allocation4 + $0x1], 0 }
   0xc   :  { %18 = vsyncpa [#allocation7], 0 }
   0xd   :  { %19 = vsyncpa [#allocation10], 0 }
   0xe   :  { %20 = vsyncpa [#allocation5], 0 }
   0xf   :  { %22 = vsyncpa [#allocation5 + $0x1], 0 }
  0x10   :  { %23 = vsyncpa [#allocation13], 0 }
  0x11   :  { %25 = vsyncpa [#allocation13 + $0x1], 0  ;;  %s2084_s30 = smov 0   ;;  %s2086_s10 = smov 0  }
  0x12   :  { %s2088_s11 = smov 0   ;;  %s2090_s12 = smov 0  }
  0x13   :  { %s2092_s13 = smov 0   ;;  %s2094_s14 = smov 0  }
  0x14   :  { %s2096_s15 = smov 0   ;;  %s2098_s16 = smov 0  }
  0x15   :  { %s2100_s17 = smov 0   ;;  %s2102_s18 = smov 0  }
  0x16   :  { %s2104_s19 = smov 0  }
  0x17 LB: > { %2660 = sst [smem:[#allocation21_spill]] %s1989_s12  ;;  %s2138_s20 = sadd.s32 4294967295, %s2017_s19   ;;  %s2017_s19 = sphi %s2104_s19, %s31_s19   ;;  %s2013_s18 = sphi %s2102_s18, %s2720_s18   ;;  %s2009_s17 = sphi %s2100_s17, %s2719_s17   ;;  %s2005_s16 = sphi %s2098_s16, %s2718_s16   ;;  %s2001_s15 = sphi %s2096_s15, %s2717_s15   ;;  %s1997_s14 = sphi %s2094_s14, %s2716_s14   ;;  %s1993_s13 = sphi %s2092_s13, %s2715_s13   ;;  %s1989_s12 = sphi %s2090_s12, %s2714_s12   ;;  %s1985_s11 = sphi %s2088_s11, %s2713_s11   ;;  %s1981_s10 = sphi %s2086_s10, %s2712_s10   ;;  %s1977_s30 = sphi %s2084_s30, %s2711_s30  }
  0x18   : > { %2661 = sst [smem:[#allocation22_spill]] %s2001_s15  ;;  %s2632_s21 = sadd.s32 4294967294, %s2017_s19  }
  0x19   : > { %2662 = sst [smem:[#allocation23_spill]] %s2005_s16  ;;  %p65_p0 = scmp.ne.s32.totalorder %s1993_s13, %s1989_s12 }
  0x1a   : > { %p2640_p1 = scmp.eq.s32.totalorder %s2138_s20, 0  ;;  %p2641_p2 = scmp.eq.s32.totalorder %s2138_s20, 3 }
  0x1b   : > { %p223_p3 = scmp.eq.s32.totalorder %s2632_s21, 3  ;;  %p270_p6 = scmp.ne.s32.totalorder %s1985_s11, %s1981_s10 }
  0x1c   : > { %p2149_p4 = por %p2640_p1, %p65_p0  ;;  %p276_p7 = scmp.ne.s32.totalorder %s1981_s10, %s1977_s30 }
  0x1d   : > { %p2154_p5 = por %p223_p3, %p65_p0  ;;  %p1211_p8 = scmp.ge.s32.totalorder %s2017_s19, 1 }
  0x1e   : > { %s2663_s22 = scalar_select %p2149_p4, 1, 0 }
  0x1f   : > { %s2664_s24 = scalar_select %p2154_p5, 1, 0 }
  0x20   : > { %p2164_p9 = por %p270_p6, %p2641_p2  ;;  %p284_p10 = scmp.lt.s32.totalorder %s2017_s19, 5 }
  0x21   : > { %2665 = sst [smem:[#allocation24_spill]] %s2664_s24  ;;  %p2169_p11 = por %p276_p7, %p223_p3 }
  0x22   : > { %s2666_s25 = scalar_select %p2164_p9, 1, 0 }
  0x23   : > { %s2668_s26 = scalar_select %p2169_p11, 1, 0 }
  0x24   : > { %2667 = sst [smem:[#allocation25_spill]] %s2666_s25  ;;  %p2173_p12 = pnand %p1211_p8, %p284_p10 }
  0x25   : > { %2669 = sst [smem:[#allocation26_spill]] %s2668_s26  ;;  %s2019_s28 = smov [#allocation6]  }
  0x26   : > { %s2670_s27 = scalar_select %p2173_p12, 1, 0 }
  0x27   : > { %s296_s29 = sshll.u32 %s2019_s28, 4  ;;  %p1578_p13 = pneg %p2173_p12  ;;  %s297_s29 = int_to_ptr.vmem [resolvable:$true] %s296_s29 }
  0x28   : > { %s2020_s21 = smov [#allocation8]   ;;  %s2672_s1 = sld [smem:[#allocation30_spill]] }
  0x29   : > { %p2181_p0 = pnand %p1578_p13, %p2640_p1  ;;  %s312_s23 = sshll.u32 %s2020_s21, 4  ;;  %s2185_s23 = int_to_ptr.vmem [resolvable:$true] %s312_s23 }
  0x2b   : > { %p2195_p6 = pneg %p2181_p0 }
  0x2e   : > { %s1709_s12 = scalar_lea.hbm %s2672_s1, 2048 }
  0x2f   : > { %p1710_p3 = scmp.ne.s32.totalorder %s2672_s1, %s1709_s12  ;;  %p1716_p10 = scmp.lt.u32.totalorder %s1709_s12, %s2672_s1 }
  0x31   : > { %p1712_p7 = pnand %p2195_p6, %p1710_p3 }
  0x33   : > { %p1713_p8 = pneg %p1712_p7 }
  0x35   : > { %p1718_p13 = pnand %p1716_p10, %p1713_p8 }
  0x37   : > { %1721 = shalt.err (!%p1718_p13)
}
  0x38   : > { %s1722_s24 = scalar_lea.vmem %s297_s29, 2048  ;;  %p1730_p5 = scmp.lt.s32.totalorder %s297_s29, %s297_s29 }
  0x39   : > { %p1723_p1 = scmp.ne.s32.totalorder %s297_s29, %s1722_s24  ;;  %p1731_p9 = scmp.lt.s32.totalorder %s1722_s24, %s1722_s24 }
  0x3b   : > { %p1725_p2 = pnand %p1723_p1, %p2195_p6  ;;  %p1732_p4 = por %p1731_p9, %p1730_p5 }
  0x3d   : > { %p1726_p11 = pneg %p1725_p2 }
  0x3f   : > { %p1733_p12 = pnand %p1732_p4, %p1726_p11 }
  0x41   : > { %1736 = shalt.err (!%p1733_p12)
}
  0x42   : > { %s2647_s9 = smov 128   ;;  %s2648_s25 = smov 8  }
  0x43   : > { %1581 = dma.hbm_to_vmem [thread:$0]  (!%p2181_p0), %s2672_s1, 2048, %s297_s29, [#allocation7], %s2647_s9, %s2647_s9, %s2648_s25  }
  0x44   : > { %s2674_s3 = sld [smem:[#allocation32_spill]] }
  0x4a   : > { %s1737_s8 = scalar_lea.hbm %s2674_s3, 2048 }
  0x4b   : > { %p1738_p1 = scmp.ne.s32.totalorder %s2674_s3, %s1737_s8  ;;  %p1744_p5 = scmp.lt.u32.totalorder %s1737_s8, %s2674_s3 }
  0x4d   : > { %p1740_p2 = pnand %p1738_p1, %p2195_p6 }
  0x4f   : > { %p1741_p4 = pneg %p1740_p2 }
  0x51   : > { %p1746_p9 = pnand %p1744_p5, %p1741_p4 }
  0x53   : > { %1749 = shalt.err (!%p1746_p9)
}
  0x54   : > { %s1750_s29 = scalar_lea.vmem %s2185_s23, 2048  ;;  %p1758_p7 = scmp.lt.s32.totalorder %s2185_s23, %s2185_s23 }
  0x55   : > { %p1751_p11 = scmp.ne.s32.totalorder %s2185_s23, %s1750_s29  ;;  %p1759_p8 = scmp.lt.s32.totalorder %s1750_s29, %s1750_s29 }
  0x57   : > { %p1753_p12 = pnand %p1751_p11, %p2195_p6  ;;  %p1760_p10 = por %p1759_p8, %p1758_p7 }
  0x59   : > { %p1754_p3 = pneg %p1753_p12 }
  0x5b   : > { %p1761_p13 = pnand %p1760_p10, %p1754_p3 }
  0x5d   : > { %1764 = shalt.err (!%p1761_p13)
}
  0x5e   : > { %1584 = dma.hbm_to_vmem [thread:$0]  (!%p2181_p0), %s2674_s3, 2048, %s2185_s23, [#allocation7], %s2647_s9, %s2647_s9, %s2648_s25  }
  0x5f   : > { %s2023_s15 = smov [#allocation9]   ;;  %s2675_s5 = sld [smem:[#allocation33_spill]] }
  0x60   : > { %s328_s16 = sshll.u32 %s2023_s15, 4  ;;  %s329_s16 = int_to_ptr.vmem [resolvable:$true] %s328_s16 }
  0x65   : > { %s1765_s26 = scalar_lea.hbm %s2675_s5, 2048 }
  0x66   : > { %p1766_p1 = scmp.ne.s32.totalorder %s2675_s5, %s1765_s26  ;;  %p1772_p5 = scmp.lt.u32.totalorder %s1765_s26, %s2675_s5 }
  0x68   : > { %p1768_p2 = pnand %p1766_p1, %p2195_p6 }
  0x6a   : > { %p1769_p4 = pneg %p1768_p2 }
  0x6c   : > { %p1774_p9 = pnand %p1772_p5, %p1769_p4 }
  0x6e   : > { %1777 = shalt.err (!%p1774_p9)
}
  0x6f   : > { %s1778_s23 = scalar_lea.vmem %s329_s16, 2048  ;;  %p1786_p7 = scmp.lt.s32.totalorder %s329_s16, %s329_s16 }
  0x70   : > { %p1779_p11 = scmp.ne.s32.totalorder %s329_s16, %s1778_s23  ;;  %p1787_p8 = scmp.lt.s32.totalorder %s1778_s23, %s1778_s23 }
  0x72   : > { %p1781_p12 = pnand %p1779_p11, %p2195_p6  ;;  %p1788_p10 = por %p1787_p8, %p1786_p7 }
  0x74   : > { %p1782_p3 = pneg %p1781_p12 }
  0x76   : > { %p1789_p13 = pnand %p1788_p10, %p1782_p3 }
  0x78   : > { %1792 = shalt.err (!%p1789_p13)
}
  0x79   : > { %1587 = dma.hbm_to_vmem [thread:$0]  (!%p2181_p0), %s2675_s5, 2048, %s329_s16, [#allocation10], %s2647_s9, %s2647_s9, %s2648_s25  }
  0x7a   : > { %s40_s28 = sadd.s32 1, %s2009_s17  ;;  %s43_s30 = sadd.s32 1, %s2013_s18 }
  0x7b   : > { %p41_p6 = scmp.ge.s32.totalorder %s40_s28, 2  ;;  %s52_s8 = sadd.s32 1, %s1997_s14 }
  0x7c   : > { %p59_p1 = scmp.ne.s32.totalorder %s1997_s14, %s1993_s13  ;;  %p60_p2 = scmp.eq.s32.totalorder %s2017_s19, 0 }
  0x7d   : > { %s2722_s28 = smov (%p41_p6, %s40_s28), 0  ;;  %s2724_s30 = smov (!%p41_p6, %s43_s30), %s2013_s18 }
  0x7e   : > { %2676 = sst [smem:[#allocation27_spill]] %s2722_s28  ;;  %s48_s15 = ssub.s32 %s2009_s17, %s2722_s28 }
  0x7f   : > { %p2272_p4 = por %p60_p2, %p59_p1  ;;  %p45_p0 = scmp.ge.s32.totalorder %s2724_s30, 2 }
  0x80   : > { %p2678_p5 = scmp.eq.s32.totalorder %s2138_s20, 3  ;;  %p1605_p11 = scmp.lt.s32.totalorder %s2017_s19, 4 }
  0x81   : > { %s345_s12 = sand.u32 1, %s1997_s14   ;;  %s2726_s30 = smov (%p45_p0, %s2724_s30), 0 }
  0x82   : > { %p2278_p9 = por %p2678_p5, %p59_p1  ;;  %2680 = sst [smem:[#allocation28_spill]] %s2726_s30 }
  0x83   : > { %s1216_s26 = sshll.u32 %s345_s12, 7  ;;  %s47_s21 = ssub.s32 %s2013_s18, %s2726_s30 }
  0x84   : > { %s49_s24 = sor.u32 %s48_s15, %s47_s21  ;;  %p258_p12 = scmp.eq.s32.totalorder %s47_s21, 0 }
  0x85   : > { %p50_p3 = scmp.eq.s32.totalorder %s49_s24, 0  ;;  %s1217_s29 = sshll.u32 %s2009_s17, 4 }
  0x86   : > { %s2681_s23 = sadd.s32 1, %s1985_s11  ;;  %s1218_s9 = sshll.u32 %s2013_s18, 5 }
  0x87   : > { %s2292_s1 = scalar_select %p258_p12, %s1985_s11, %s2681_s23  }
  0x88   : > { %s2295_s6 = scalar_select %p50_p3, %s1997_s14, %s52_s8  }
  0x89   : > { %s349_s25 = scalar_lea.vmem [#allocation3], %s1216_s26  ;;  %s355_s5 = sadd.s32 %s1218_s9, %s1217_s29 }
  0x8a   : > { %s358_s3 = sshll.u32 %s349_s25, 4  ;;  %s1219_s28 = sshll.u32 %s355_s5, 7  ;;  %s2298_s3 = int_to_ptr.vmem [resolvable:$true] %s358_s3 }
  0x8b   : > { %p2304_p7 = pnand %p1605_p11, %p2272_p4  ;;  %s2683_s0 = sld [smem:[#allocation29_spill]] }
  0x8c   : > { %s2313_s9 = scalar_lea.sflag [#allocation4], %s345_s12 }
  0x8d   : > { %p1795_p10 = pneg %p2304_p7 }
  0x91   : > { %s2311_s8 = scalar_lea.hbm %s2683_s0, %s1219_s28  ;;  %s1798_s26 = scalar_lea.hbm %s2683_s0, 8192 }
  0x92   : > { %s1793_s5 = scalar_lea.hbm %s2311_s8, 2048  ;;  %p1799_p1 = scmp.lt.u32.totalorder %s2311_s8, %s2683_s0 }
  0x93   : > { %p1794_p8 = scmp.ne.s32.totalorder %s2311_s8, %s1793_s5  ;;  %p1800_p2 = scmp.lt.u32.totalorder %s1798_s26, %s1793_s5 }
  0x94   : > { %p1802_p0 = scmp.lt.u32.totalorder %s1793_s5, %s2311_s8 }
  0x95   : > { %p1796_p13 = pnand %p1795_p10, %p1794_p8  ;;  %p1801_p4 = por %p1800_p2, %p1799_p1 }
  0x97   : > { %p1797_p6 = pneg %p1796_p13  ;;  %p1803_p5 = por %p1802_p0, %p1801_p4 }
  0x99   : > { %p1804_p11 = pnand %p1803_p5, %p1797_p6 }
  0x9b   : > { %1807 = shalt.err (!%p1804_p11)
}
  0x9c   : > { %s1808_s12 = scalar_lea.vmem %s2298_s3, 2048  ;;  %s2024_s29 = smov [#allocation3]  }
  0x9d   : > { %p1809_p12 = scmp.ne.s32.totalorder %s2298_s3, %s1808_s12  ;;  %s1813_s23 = sshll.u32 %s2024_s29, 4  ;;  %s1814_s23 = int_to_ptr.vmem [resolvable:$false] %s1813_s23 }
  0x9e   : > { %s1815_s15 = scalar_lea.vmem %s1814_s23, 4096  ;;  %p1816_p13 = scmp.lt.s32.totalorder %s2298_s3, %s1814_s23 }
  0x9f   : > { %p1811_p3 = pnand %p1809_p12, %p1795_p10  ;;  %p1817_p1 = scmp.lt.s32.totalorder %s1815_s15, %s1808_s12 }
  0xa1   : > { %p1812_p8 = pneg %p1811_p3  ;;  %p1818_p2 = por %p1817_p1, %p1816_p13 }
  0xa3   : > { %p1819_p4 = pnand %p1818_p2, %p1812_p8 }
  0xa5   : > { %1822 = shalt.err (!%p1819_p4)
}
  0xa6   : > { %s2684_s21 = smov 8   ;;  %s2685_s5 = smov 128  }
  0xa7   : > { %1591 = dma.hbm_to_vmem [thread:$0]  (!%p2304_p7), %s2311_s8, 2048, %s2298_s3, %s2313_s9, %s2685_s5, %s2685_s5, %s2684_s21  }
  0xa8   : > { %p2686_p10 = scmp.ne.s32.totalorder %s2670_s27, 0 }
  0xa9   : > { %s2347_s25 = sand.u32 (!%p2686_p10), 1, %s1993_s13   ;;  %p2687_p6 = scmp.ne.s32.totalorder (!%p2686_p10), %s2663_s22, 0 }
  0xaa   : > { %370 = sbr.rel (%p2686_p10) target bundleno = 1035 (0x40b), region = 48  ;;  %s2350_s7 = sshll.u32 (!%p2686_p10), %s2347_s25, 7 }
  0xab   : > { %s373_s30 = scalar_lea.sflag (!%p2686_p10), [#allocation4], %s2347_s25  ;;  %s2354_s26 = scalar_lea.vmem (!%p2686_p10), [#allocation3], %s2350_s7 }
  0xb1   : > { %1952 = dma.done.wait (%p2687_p6), %s373_s30, 2048  }
  0xb2   : > { %1954 = vsyncadd (%p2687_p6), %s373_s30, 4294965248  ;;  %p2688_p7 = scmp.eq.s32.totalorder %s2138_s20, 0 }
  0xb4   : > { %1956 = dma.done.wait (%p2688_p7), [#allocation7], 4096   ;;  %p2689_p0 = pmov %p2688_p7 }
  0xb6   : > { %1958 = vsyncadd (%p2689_p0), [#allocation7], 4294963200  ;;  %p2690_p5 = pmov %p2689_p0 }
  0xb7   : > { %p2691_p11 = pmov %p2689_p0 }
  0xb8   : > { %1960 = dma.done.wait (%p2690_p5), [#allocation10], 2048  }
  0xb9   : > { %1962 = vsyncadd (%p2691_p11), [#allocation10], 4294965248  ;;  %s430_s3 = sand.u32 1, %s1981_s10   ;;  %v451_v0 = vld [vmem:[#allocation6] sm:$0xff]  ;;  %v452_v1 = vld [vmem:[#allocation6 + $0x8] sm:$0xff]  ;;  %s2692_s2 = sld [smem:[#allocation31_spill]] }
  0xba   : > { %v453_v2 = vld [vmem:[#allocation6 + $0x10] sm:$0xff]  ;;  %v1470_v3 = vpack.c.bf16 %v452_v1, %v451_v0  ;;  %v454_v4 = vld [vmem:[#allocation6 + $0x18] sm:$0xff]  ;;  %v455_v6 = vld [vmem:[#allocation6 + $0x20] sm:$0xff]  ;;  %s2393_s8 = scalar_lea.vmem [#allocation11], %s2350_s7  ;;  %s2435_s24 = scalar_lea.vmem [#allocation12], %s2350_s7 }
  0xbb   : > { %v1474_v5 = vpack.c.bf16 %v454_v4, %v453_v2  ;;  %v456_v7 = vld [vmem:[#allocation6 + $0x28] sm:$0xff]  ;;  %v435_v9 = vld [vmem:[%s2354_s26] sm:$0xff]  ;;  %v457_v10 = vld [vmem:[#allocation6 + $0x30] sm:$0xff]  ;;  %s2462_s12 = scalar_lea.vmem [#allocation14], %s430_s3  ;;  %s2693_s29 = sld [smem:[#allocation22_spill]] }
  0xbc   : > { %1471 = vmatprep.subr.bf16.mxu0 %v1470_v3  ;;  %v1478_v8 = vpack.c.bf16 %v456_v7, %v455_v6  ;;  %v458_v11 = vld [vmem:[#allocation6 + $0x38] sm:$0xff]  ;;  %1355 = vmatprep.mubr.f32.mxu0 %v435_v9  ;;  %v459_v13 = vld [vmem:[#allocation6 + $0x40] sm:$0xff]  ;;  %v460_v14 = vld [vmem:[#allocation6 + $0x48] sm:$0xff] }
  0xbd   : > { %1473 = vmatpush3.bf16.msra.mxu0 %v1470_v3  ;;  %v1482_v12 = vpack.c.bf16 %v458_v11, %v457_v10  ;;  %v651_v15 = vld [vmem:[#allocation8] sm:$0xff]  ;;  %v652_v16 = vld [vmem:[#allocation8 + $0x8] sm:$0xff]  ;;  %v653_v17 = vld [vmem:[#allocation8 + $0x10] sm:$0xff]  ;;  %v1486_v21 = vpack.c.bf16 %v460_v14, %v459_v13 }
  0xbe   : > { %1475 = vmatprep.subr.bf16.mxu0 %v1474_v5  ;;  %v654_v18 = vld [vmem:[#allocation8 + $0x18] sm:$0xff]  ;;  %v1502_v19 = vpack.c.bf16 %v652_v16, %v651_v15  ;;  %v655_v22 = vld [vmem:[#allocation8 + $0x20] sm:$0xff]  ;;  %v656_v23 = vld [vmem:[#allocation8 + $0x28] sm:$0xff] }
  0xbf   : > { %v1506_v20 = vpack.c.bf16 %v654_v18, %v653_v17  ;;  %v461_v24 = vld [vmem:[#allocation6 + $0x50] sm:$0xff]  ;;  %v462_v25 = vld [vmem:[#allocation6 + $0x58] sm:$0xff]  ;;  %v1510_v26 = vpack.c.bf16 %v656_v23, %v655_v22  ;;  %v463_v30 = vld [vmem:[#allocation6 + $0x60] sm:$0xff] }
  0xc0   : > { %1503 = vmatprep.subr.bf16.mxu1 %v1502_v19  ;;  %v1490_v27 = vpack.c.bf16 %v462_v25, %v461_v24  ;;  %v657_v28 = vld [vmem:[#allocation8 + $0x30] sm:$0xff]  ;;  %v658_v29 = vld [vmem:[#allocation8 + $0x38] sm:$0xff]  ;;  %v464_v31 = vld [vmem:[#allocation6 + $0x68] sm:$0xff] }
  0xc1   : > { %1477 = vmatpush3.bf16.msra.mxu0 %v1474_v5  ;;  %1505 = vmatpush3.bf16.msra.mxu1 %v1502_v19  ;;  %v1514_v32 = vpack.c.bf16 %v658_v29, %v657_v28  ;;  %v1494_v33 = vpack.c.bf16 %v464_v31, %v463_v30  ;;  %v659_v34 = vld [vmem:[#allocation8 + $0x40] sm:$0xff]  ;;  %v660_v35 = vld [vmem:[#allocation8 + $0x48] sm:$0xff]  ;;  %v465_v36 = vld [vmem:[#allocation6 + $0x70] sm:$0xff]  ;;  %p1229_p12 = scmp.ne.s32.totalorder %s2693_s29, 0 }
  0xc2   : > { %1479 = vmatprep.subr.bf16.mxu0 %v1478_v8  ;;  %1507 = vmatprep.subr.bf16.mxu1 %v1506_v20  ;;  %v466_v37 = vld [vmem:[#allocation6 + $0x78] sm:$0xff]  ;;  %v1518_v38 = vpack.c.bf16 %v660_v35, %v659_v34  ;;  %v661_v40 = vld [vmem:[#allocation8 + $0x50] sm:$0xff]  ;;  %v663_v43 = vld [vmem:[#allocation8 + $0x60] sm:$0xff] }
  0xc3   : > { %v1498_v39 = vpack.c.bf16 %v466_v37, %v465_v36  ;;  %v662_v41 = vld [vmem:[#allocation8 + $0x58] sm:$0xff]  ;;  %v664_v44 = vld [vmem:[#allocation8 + $0x68] sm:$0xff]  ;;  %v437_v47 = vld [vmem:[%s2354_s26 + $0x10] sm:$0xff] }
  0xc4   : > { %v1522_v42 = vpack.c.bf16 %v662_v41, %v661_v40  ;;  %v436_v45 = vld [vmem:[%s2354_s26 + $0x8] sm:$0xff]  ;;  %v1526_v46 = vpack.c.bf16 %v664_v44, %v663_v43  ;;  %v438_v48 = vld [vmem:[%s2354_s26 + $0x18] sm:$0xff]  ;;  %v439_v49 = vld [vmem:[%s2354_s26 + $0x20] sm:$0xff] }
  0xc5   : > { %1481 = vmatpush3.bf16.msra.mxu0 %v1478_v8  ;;  %1509 = vmatpush3.bf16.msra.mxu1 %v1506_v20  ;;  %v440_v50 = vld [vmem:[%s2354_s26 + $0x28] sm:$0xff]  ;;  %v441_v51 = vld [vmem:[%s2354_s26 + $0x30] sm:$0xff]  ;;  %v442_v52 = vld [vmem:[%s2354_s26 + $0x38] sm:$0xff] }
  0xc6   : > { %1483 = vmatprep.subr.bf16.mxu0 %v1482_v12  ;;  %1511 = vmatprep.subr.bf16.mxu1 %v1510_v26  ;;  %v443_v53 = vld [vmem:[%s2354_s26 + $0x40] sm:$0xff]  ;;  %v444_v54 = vld [vmem:[%s2354_s26 + $0x48] sm:$0xff]  ;;  %v445_v55 = vld [vmem:[%s2354_s26 + $0x50] sm:$0xff] }
  0xc7   : > { %v446_v56 = vld [vmem:[%s2354_s26 + $0x58] sm:$0xff]  ;;  %v447_v57 = vld [vmem:[%s2354_s26 + $0x60] sm:$0xff]  ;;  %v448_v58 = vld [vmem:[%s2354_s26 + $0x68] sm:$0xff] }
  0xc8   : > { %v449_v59 = vld [vmem:[%s2354_s26 + $0x70] sm:$0xff]  ;;  %v450_v60 = vld [vmem:[%s2354_s26 + $0x78] sm:$0xff] }
  0xc9   : > { %1485 = vmatpush3.bf16.msra.mxu0 %v1482_v12  ;;  %1513 = vmatpush3.bf16.msra.mxu1 %v1510_v26  ;;  %v665_v61 = vld [vmem:[#allocation8 + $0x70] sm:$0xff]  ;;  %v666_v62 = vld [vmem:[#allocation8 + $0x78] sm:$0xff] }
  0xca   : > { %1487 = vmatprep.subr.bf16.mxu0 %v1486_v21  ;;  %1515 = vmatprep.subr.bf16.mxu1 %v1514_v32  ;;  %v1530_v63 = vpack.c.bf16 %v666_v62, %v665_v61  ;;  %v2388_v0 = vld [vmem:[%s2692_s2] ss:$0 sm:$0xff] }
  0xcd   : > { %1489 = vmatpush3.bf16.msra.mxu0 %v1486_v21  ;;  %1517 = vmatpush3.bf16.msra.mxu1 %v1514_v32 }
  0xce   : > { %1491 = vmatprep.subr.bf16.mxu0 %v1490_v27  ;;  %1519 = vmatprep.subr.bf16.mxu1 %v1518_v38 }
  0xd1   : > { %1493 = vmatpush3.bf16.msra.mxu0 %v1490_v27  ;;  %1521 = vmatpush3.bf16.msra.mxu1 %v1518_v38 }
  0xd2   : > { %1495 = vmatprep.subr.bf16.mxu0 %v1494_v33  ;;  %1523 = vmatprep.subr.bf16.mxu1 %v1522_v42 }
  0xd5   : > { %1497 = vmatpush3.bf16.msra.mxu0 %v1494_v33  ;;  %1525 = vmatpush3.bf16.msra.mxu1 %v1522_v42 }
  0xd6   : > { %1499 = vmatprep.subr.bf16.mxu0 %v1498_v39  ;;  %1527 = vmatprep.subr.bf16.mxu1 %v1526_v46 }
  0xd9   : > { %1501 = vmatpush3.bf16.msra.mxu0 %v1498_v39  ;;  %1529 = vmatpush3.bf16.msra.mxu1 %v1526_v46 }
  0xda   : > { %1531 = vmatprep.subr.bf16.mxu1 %v1530_v63 }
  0xdc   : > { %1356 = vmatmul.mubr.f32.vlgmr.msra.gmra.mrb[0].mxu0 %v436_v45 }
  0xdd   : > { %1358 = vmatprep.mubr.f32.mxu0 %v437_v47  ;;  %1533 = vmatpush3.bf16.msra.mxu1 %v1530_v63 }
  0xe0   : > { %1359 = vmatmul.mubr.f32.gmra.mrb[2].mxu0 %v438_v48 }
  0xe1   : > { %1361 = vmatprep.mubr.f32.mxu0 %v439_v49  ;;  %v1228_v49 = vld [vmem:[%s2626_s4] ss:$0 sm:$0xff] }
  0xe4   : > { %1362 = vmatmul.mubr.f32.gmra.mrb[4].mxu0 %v440_v50 }
  0xe5   : > { %1364 = vmatprep.mubr.f32.mxu0 %v441_v51 }
  0xe8   : > { %1365 = vmatmul.mubr.f32.gmra.mrb[6].mxu0 %v442_v52 }
  0xe9   : > { %1367 = vmatprep.mubr.f32.mxu0 %v443_v53 }
  0xec   : > { %1368 = vmatmul.mubr.f32.gmra.mrb[8].mxu0 %v444_v54 }
  0xed   : > { %1370 = vmatprep.mubr.f32.mxu0 %v445_v55 }
  0xf0   : > { %1371 = vmatmul.mubr.f32.gmra.mrb[10].mxu0 %v446_v56 }
  0xf1   : > { %1373 = vmatprep.mubr.f32.mxu0 %v447_v57 }
  0xf4   : > { %1374 = vmatmul.mubr.f32.gmra.mrb[12].mxu0 %v448_v58 }
  0xf5   : > { %1376 = vmatprep.mubr.f32.mxu0 %v449_v59 }
  0xf8   : > { %1377 = vmatmul.mubr.f32.gmra.mrb[14].mxu0 %v450_v60 }
 0x1af   : > { %v1357_v1 = vpop.f32.mrb[0].mxu0 }
 0x1b0   : > { %v546_v2 = vadd.f32 %v1357_v1, %v2388_v0  ;;  %v540_v3 = vpop.f32.mrb[1].mxu0 }
 0x1b1   : > { %v541_v4 = vadd.f32 %v2388_v0, %v540_v3 }
 0x1b2   : > { %v620_v5 = vmax.f32 %v546_v2, 0.0 }
 0x1b3   : > { %v619_v6 = vmax.f32 %v541_v4, 0.0  ;;  %v1360_v7 = vpop.f32.mrb[2].mxu0 }
 0x1b4   : > { %636 = vst [vmem:[%s2393_s8 + $0x8] sm:$0xff] %v620_v5  ;;  %v556_v8 = vadd.f32 %v1360_v7, %v2388_v0  ;;  %v550_v9 = vpop.f32.mrb[3].mxu0 }
 0x1b5   : > { %635 = vst [vmem:[%s2393_s8] sm:$0xff] %v619_v6  ;;  %v551_v10 = vadd.f32 %v2388_v0, %v550_v9  ;;  %1411 = vmatprep.mubr.f32.mxu1 %v619_v6 }
 0x1b6   : > { %v622_v11 = vmax.f32 %v556_v8, 0.0  ;;  %1412 = vmatmul.mubr.f32.vlgmr.msra.gmra.mrb[0].mxu1 %v620_v5 }
 0x1b7   : > { %v621_v12 = vmax.f32 %v551_v10, 0.0  ;;  %v1363_v13 = vpop.f32.mrb[4].mxu0 }
 0x1b8   : > { %638 = vst [vmem:[%s2393_s8 + $0x18] sm:$0xff] %v622_v11  ;;  %v566_v14 = vadd.f32 %v1363_v13, %v2388_v0  ;;  %v560_v15 = vpop.f32.mrb[5].mxu0 }
 0x1b9   : > { %637 = vst [vmem:[%s2393_s8 + $0x10] sm:$0xff] %v621_v12  ;;  %v561_v16 = vadd.f32 %v2388_v0, %v560_v15  ;;  %1414 = vmatprep.mubr.f32.mxu1 %v621_v12 }
 0x1ba   : > { %v624_v17 = vmax.f32 %v566_v14, 0.0  ;;  %1415 = vmatmul.mubr.f32.gmra.mrb[2].mxu1 %v622_v11 }
 0x1bb   : > { %v623_v18 = vmax.f32 %v561_v16, 0.0  ;;  %v1366_v19 = vpop.f32.mrb[6].mxu0 }
 0x1bc   : > { %640 = vst [vmem:[%s2393_s8 + $0x28] sm:$0xff] %v624_v17  ;;  %v576_v20 = vadd.f32 %v1366_v19, %v2388_v0  ;;  %v570_v21 = vpop.f32.mrb[7].mxu0 }
 0x1bd   : > { %639 = vst [vmem:[%s2393_s8 + $0x20] sm:$0xff] %v623_v18  ;;  %v571_v22 = vadd.f32 %v2388_v0, %v570_v21  ;;  %1417 = vmatprep.mubr.f32.mxu1 %v623_v18 }
 0x1be   : > { %v626_v23 = vmax.f32 %v576_v20, 0.0  ;;  %1418 = vmatmul.mubr.f32.gmra.mrb[4].mxu1 %v624_v17 }
 0x1bf   : > { %v625_v24 = vmax.f32 %v571_v22, 0.0  ;;  %v1369_v25 = vpop.f32.mrb[8].mxu0 }
 0x1c0   : > { %642 = vst [vmem:[%s2393_s8 + $0x38] sm:$0xff] %v626_v23  ;;  %v586_v26 = vadd.f32 %v1369_v25, %v2388_v0  ;;  %v580_v27 = vpop.f32.mrb[9].mxu0 }
 0x1c1   : > { %641 = vst [vmem:[%s2393_s8 + $0x30] sm:$0xff] %v625_v24  ;;  %v581_v28 = vadd.f32 %v2388_v0, %v580_v27  ;;  %1420 = vmatprep.mubr.f32.mxu1 %v625_v24 }
 0x1c2   : > { %v628_v29 = vmax.f32 %v586_v26, 0.0  ;;  %1421 = vmatmul.mubr.f32.gmra.mrb[6].mxu1 %v626_v23 }
 0x1c3   : > { %v627_v30 = vmax.f32 %v581_v28, 0.0  ;;  %v1372_v31 = vpop.f32.mrb[10].mxu0 }
 0x1c4   : > { %644 = vst [vmem:[%s2393_s8 + $0x48] sm:$0xff] %v628_v29  ;;  %v596_v32 = vadd.f32 %v1372_v31, %v2388_v0  ;;  %v590_v33 = vpop.f32.mrb[11].mxu0 }
 0x1c5   : > { %643 = vst [vmem:[%s2393_s8 + $0x40] sm:$0xff] %v627_v30  ;;  %v591_v34 = vadd.f32 %v2388_v0, %v590_v33  ;;  %1423 = vmatprep.mubr.f32.mxu1 %v627_v30 }
 0x1c6   : > { %v630_v35 = vmax.f32 %v596_v32, 0.0  ;;  %1424 = vmatmul.mubr.f32.gmra.mrb[8].mxu1 %v628_v29 }
 0x1c7   : > { %v629_v36 = vmax.f32 %v591_v34, 0.0  ;;  %v1375_v37 = vpop.f32.mrb[12].mxu0  ;;  %v2025_v34 = vmov (!%p1229_p12), 0.0  }
 0x1c8   : > { %646 = vst [vmem:[%s2393_s8 + $0x58] sm:$0xff] %v630_v35  ;;  %v606_v38 = vadd.f32 %v1375_v37, %v2388_v0  ;;  %v600_v39 = vpop.f32.mrb[13].mxu0  ;;  %855 = vst [vmem:[#allocation2] sm:$0x1] (!%p1229_p12), %v2025_v34 }
 0x1c9   : > { %645 = vst [vmem:[%s2393_s8 + $0x50] sm:$0xff] %v629_v36  ;;  %v601_v40 = vadd.f32 %v2388_v0, %v600_v39  ;;  %1426 = vmatprep.mubr.f32.mxu1 %v629_v36 }
 0x1ca   : > { %v632_v41 = vmax.f32 %v606_v38, 0.0  ;;  %1427 = vmatmul.mubr.f32.gmra.mrb[10].mxu1 %v630_v35 }
 0x1cb   : > { %v631_v42 = vmax.f32 %v601_v40, 0.0  ;;  %v1378_v43 = vpop.f32.mrb[14].mxu0 }
 0x1cc   : > { %648 = vst [vmem:[%s2393_s8 + $0x68] sm:$0xff] %v632_v41  ;;  %v616_v44 = vadd.f32 %v1378_v43, %v2388_v0  ;;  %v610_v45 = vpop.f32.mrb[15].mxu0 }
 0x1cd   : > { %647 = vst [vmem:[%s2393_s8 + $0x60] sm:$0xff] %v631_v42  ;;  %v611_v46 = vadd.f32 %v2388_v0, %v610_v45  ;;  %1429 = vmatprep.mubr.f32.mxu1 %v631_v42 }
 0x1ce   : > { %v634_v47 = vmax.f32 %v616_v44, 0.0  ;;  %1430 = vmatmul.mubr.f32.gmra.mrb[12].mxu1 %v632_v41 }
 0x1cf   : > { %v633_v48 = vmax.f32 %v611_v46, 0.0 }
 0x1d0   : > { %650 = vst [vmem:[%s2393_s8 + $0x78] sm:$0xff] %v634_v47 }
 0x1d1   : > { %649 = vst [vmem:[%s2393_s8 + $0x70] sm:$0xff] %v633_v48  ;;  %1432 = vmatprep.mubr.f32.mxu1 %v633_v48 }
 0x1d2   : > { %1433 = vmatmul.mubr.f32.gmra.mrb[14].mxu1 %v634_v47 }
 0x289   : > { %v1413_v50 = vpop.f32.mrb[0].mxu1 }
 0x28a   : > { %v2428_v51 = vadd.f32 %v1413_v50, %v1228_v49  ;;  %v740_v52 = vpop.f32.mrb[1].mxu1 }
 0x28b   : > { %v2430_v53 = vadd.f32 %v1228_v49, %v740_v52 }
 0x28c   : > { %v820_v54 = vmax.f32 %v2428_v51, 0.0 }
 0x28d   : > { %v819_v55 = vmax.f32 %v2430_v53, 0.0  ;;  %v1416_v56 = vpop.f32.mrb[2].mxu1 }
 0x28e   : > { %836 = vst [vmem:[%s2435_s24 + $0x8] sm:$0xff] %v820_v54  ;;  %v2440_v57 = vadd.f32 %v1416_v56, %v1228_v49  ;;  %v750_v58 = vpop.f32.mrb[3].mxu1 }
 0x28f   : > { %835 = vst [vmem:[%s2435_s24] sm:$0xff] %v819_v55  ;;  %v751_v59 = vadd.f32 %v1228_v49, %v750_v58 }
 0x290   : > { %v822_v60 = vmax.f32 %v2440_v57, 0.0 }
 0x291   : > { %v821_v61 = vmax.f32 %v751_v59, 0.0  ;;  %v1419_v62 = vpop.f32.mrb[4].mxu1 }
 0x292   : > { %838 = vst [vmem:[%s2435_s24 + $0x18] sm:$0xff] %v822_v60  ;;  %v766_v63 = vadd.f32 %v1419_v62, %v1228_v49  ;;  %v760_v0 = vpop.f32.mrb[5].mxu1 }
 0x293   : > { %837 = vst [vmem:[%s2435_s24 + $0x10] sm:$0xff] %v821_v61  ;;  %v761_v1 = vadd.f32 %v1228_v49, %v760_v0 }
 0x294   : > { %v824_v2 = vmax.f32 %v766_v63, 0.0 }
 0x295   : > { %v823_v3 = vmax.f32 %v761_v1, 0.0  ;;  %v1422_v4 = vpop.f32.mrb[6].mxu1 }
 0x296   : > { %840 = vst [vmem:[%s2435_s24 + $0x28] sm:$0xff] %v824_v2  ;;  %v776_v5 = vadd.f32 %v1422_v4, %v1228_v49  ;;  %v770_v6 = vpop.f32.mrb[7].mxu1 }
 0x297   : > { %839 = vst [vmem:[%s2435_s24 + $0x20] sm:$0xff] %v823_v3  ;;  %v771_v7 = vadd.f32 %v1228_v49, %v770_v6 }
 0x298   : > { %v826_v8 = vmax.f32 %v776_v5, 0.0 }
 0x299   : > { %v825_v9 = vmax.f32 %v771_v7, 0.0  ;;  %v1425_v10 = vpop.f32.mrb[8].mxu1 }
 0x29a   : > { %842 = vst [vmem:[%s2435_s24 + $0x38] sm:$0xff] %v826_v8  ;;  %v786_v11 = vadd.f32 %v1425_v10, %v1228_v49  ;;  %v780_v12 = vpop.f32.mrb[9].mxu1 }
 0x29b   : > { %841 = vst [vmem:[%s2435_s24 + $0x30] sm:$0xff] %v825_v9  ;;  %v781_v13 = vadd.f32 %v1228_v49, %v780_v12 }
 0x29c   : > { %v828_v14 = vmax.f32 %v786_v11, 0.0 }
 0x29d   : > { %v827_v15 = vmax.f32 %v781_v13, 0.0  ;;  %v1428_v16 = vpop.f32.mrb[10].mxu1 }
 0x29e   : > { %844 = vst [vmem:[%s2435_s24 + $0x48] sm:$0xff] %v828_v14  ;;  %v796_v17 = vadd.f32 %v1428_v16, %v1228_v49  ;;  %v790_v18 = vpop.f32.mrb[11].mxu1 }
 0x29f   : > { %843 = vst [vmem:[%s2435_s24 + $0x40] sm:$0xff] %v827_v15  ;;  %v791_v19 = vadd.f32 %v1228_v49, %v790_v18 }
 0x2a0   : > { %v830_v20 = vmax.f32 %v796_v17, 0.0 }
 0x2a1   : > { %v829_v21 = vmax.f32 %v791_v19, 0.0  ;;  %v1431_v22 = vpop.f32.mrb[12].mxu1 }
 0x2a2   : > { %846 = vst [vmem:[%s2435_s24 + $0x58] sm:$0xff] %v830_v20  ;;  %v806_v23 = vadd.f32 %v1431_v22, %v1228_v49  ;;  %v800_v24 = vpop.f32.mrb[13].mxu1 }
 0x2a3   : > { %845 = vst [vmem:[%s2435_s24 + $0x50] sm:$0xff] %v829_v21  ;;  %v801_v25 = vadd.f32 %v1228_v49, %v800_v24 }
 0x2a4   : > { %v832_v26 = vmax.f32 %v806_v23, 0.0 }
 0x2a5   : > { %v831_v27 = vmax.f32 %v801_v25, 0.0  ;;  %v1434_v28 = vpop.f32.mrb[14].mxu1  ;;  %854 = sbr.rel (%p1229_p12) target bundleno = 684 (0x2ac), region = 68 }
 0x2a6   : > { %848 = vst [vmem:[%s2435_s24 + $0x68] sm:$0xff] %v832_v26  ;;  %v816_v29 = vadd.f32 %v1434_v28, %v1228_v49  ;;  %v810_v30 = vpop.f32.mrb[15].mxu1 }
 0x2a7   : > { %847 = vst [vmem:[%s2435_s24 + $0x60] sm:$0xff] %v831_v27  ;;  %v811_v31 = vadd.f32 %v1228_v49, %v810_v30 }
 0x2a8   : > { %v834_v32 = vmax.f32 %v816_v29, 0.0 }
 0x2a9   : > { %v833_v33 = vmax.f32 %v811_v31, 0.0 }
 0x2aa   : > { %850 = vst [vmem:[%s2435_s24 + $0x78] sm:$0xff] %v834_v32 }
 0x2ab   : > { %849 = vst [vmem:[%s2435_s24 + $0x70] sm:$0xff] %v833_v33 }
 0x2ac PF: > { %v857_v35 = vadd.f32 %v820_v54, %v819_v55  ;;  %v856_v54 = vld [vmem:[#allocation2] sm:$0x1]  ;;  %s2694_s23 = sld [smem:[#allocation22_spill]] }
 0x2ae   : > { %v858_v36 = vadd.f32 %v857_v35, %v821_v61 }
 0x2b0   : > { %v859_v37 = vadd.f32 %v858_v36, %v822_v60 }
 0x2b2   : > { %v860_v38 = vadd.f32 %v859_v37, %v823_v3  ;;  %p1230_p3 = scmp.ne.s32.totalorder %s2694_s23, 1 }
 0x2b3   : > { %v886_v58 = vld [vmem:[#allocation9] sm:$0xff] (!%p1230_p3)  ;;  %v887_v59 = vld [vmem:[#allocation9 + $0x8] sm:$0xff] (!%p1230_p3)  ;;  %v888_v60 = vld [vmem:[#allocation9 + $0x10] sm:$0xff] (!%p1230_p3)  ;;  %v2026_v61 = vmov (!%p1230_p3), 0.0|0.0   ;;  %vm2027_vm0 = vmmov (!%p1230_p3), 0   ;;  %v2028_v0 = vmov (!%p1230_p3), 0.0  }
 0x2b4   : > { %v861_v39 = vadd.f32 %v860_v38, %v824_v2  ;;  %1534 = vmatprep.subr.bf16.mxu0 (!%p1230_p3), %v2026_v61  ;;  %v1535_v62 = vpack.c.bf16 (!%p1230_p3), %v887_v59, %v886_v58  ;;  %v889_v63 = vld [vmem:[#allocation9 + $0x18] sm:$0xff] (!%p1230_p3)  ;;  %1467 = vmatprep.mubr.msk.f32.mxu0 (!%p1230_p3), %vm2027_vm0, %v2028_v0  ;;  %v890_v2 = vld [vmem:[#allocation9 + $0x20] sm:$0xff] (!%p1230_p3)  ;;  %v891_v3 = vld [vmem:[#allocation9 + $0x28] sm:$0xff] (!%p1230_p3)  ;;  %s2695_s5 = sld [smem:[#allocation34_spill]] (!%p1230_p3) }
 0x2b5   : > { %v1538_v1 = vpack.c.bf16 (!%p1230_p3), %v889_v63, %v888_v60  ;;  %v1541_v4 = vpack.c.bf16 (!%p1230_p3), %v891_v3, %v890_v2  ;;  %v892_v5 = vld [vmem:[#allocation9 + $0x30] sm:$0xff] (!%p1230_p3)  ;;  %v893_v6 = vld [vmem:[#allocation9 + $0x38] sm:$0xff] (!%p1230_p3) }
 0x2b6   : > { %v862_v40 = vadd.f32 %v861_v39, %v825_v9  ;;  %1536 = vmatpush3.bf16.msra.mxu0 (!%p1230_p3), %v1535_v62  ;;  %v1544_v7 = vpack.c.bf16 (!%p1230_p3), %v893_v6, %v892_v5  ;;  %v895_v9 = vld [vmem:[#allocation9 + $0x48] sm:$0xff] (!%p1230_p3)  ;;  %v896_v11 = vld [vmem:[#allocation9 + $0x50] sm:$0xff] (!%p1230_p3)  ;;  %v897_v12 = vld [vmem:[#allocation9 + $0x58] sm:$0xff] (!%p1230_p3) }
 0x2b7   : > { %1537 = vmatprep.subr.bf16.mxu0 (!%p1230_p3), %v2026_v61  ;;  %v1550_v13 = vpack.c.bf16 (!%p1230_p3), %v897_v12, %v896_v11  ;;  %v900_v17 = vld [vmem:[#allocation9 + $0x70] sm:$0xff] (!%p1230_p3)  ;;  %v901_v18 = vld [vmem:[#allocation9 + $0x78] sm:$0xff] (!%p1230_p3) }
 0x2b8   : > { %v863_v41 = vadd.f32 %v862_v40, %v826_v8  ;;  %v894_v8 = vld [vmem:[#allocation9 + $0x40] sm:$0xff] (!%p1230_p3)  ;;  %v1556_v19 = vpack.c.bf16 (!%p1230_p3), %v901_v18, %v900_v17 }
 0x2b9   : > { %v1547_v10 = vpack.c.bf16 (!%p1230_p3), %v895_v9, %v894_v8 }
 0x2ba   : > { %v864_v42 = vadd.f32 %v863_v41, %v827_v15  ;;  %1539 = vmatpush3.bf16.msra.mxu0 (!%p1230_p3), %v1538_v1  ;;  %v899_v15 = vld [vmem:[#allocation9 + $0x68] sm:$0xff] (!%p1230_p3)  ;;  %v902_v22 = vld [vmem:[%s2695_s5] sm:$0x1] (!%p1230_p3) }
 0x2bb   : > { %1540 = vmatprep.subr.bf16.mxu0 (!%p1230_p3), %v2026_v61 }
 0x2bc   : > { %v865_v43 = vadd.f32 %v864_v42, %v828_v14  ;;  %v898_v14 = vld [vmem:[#allocation9 + $0x60] sm:$0xff] (!%p1230_p3) }
 0x2bd   : > { %v1553_v16 = vpack.c.bf16 (!%p1230_p3), %v899_v15, %v898_v14 }
 0x2be   : > { %v866_v44 = vadd.f32 %v865_v43, %v829_v21  ;;  %1542 = vmatpush3.bf16.msra.mxu0 (!%p1230_p3), %v1541_v4 }
 0x2bf   : > { %1543 = vmatprep.subr.bf16.mxu0 (!%p1230_p3), %v2026_v61 }
 0x2c0   : > { %v867_v45 = vadd.f32 %v866_v44, %v830_v20 }
 0x2c2   : > { %v868_v46 = vadd.f32 %v867_v45, %v831_v27  ;;  %1545 = vmatpush3.bf16.msra.mxu0 (!%p1230_p3), %v1544_v7 }
 0x2c3   : > { %1546 = vmatprep.subr.bf16.mxu0 (!%p1230_p3), %v2026_v61 }
 0x2c4   : > { %v869_v47 = vadd.f32 %v868_v46, %v832_v26 }
 0x2c6   : > { %v870_v48 = vadd.f32 %v869_v47, %v833_v33  ;;  %1548 = vmatpush3.bf16.msra.mxu0 (!%p1230_p3), %v1547_v10 }
 0x2c7   : > { %1549 = vmatprep.subr.bf16.mxu0 (!%p1230_p3), %v2026_v61 }
 0x2c8   : > { %v871_v49 = vadd.f32 %v870_v48, %v834_v32 }
 0x2ca   : > { %v872_v50 = vrot.slane %v871_v49, 4  ;;  %1551 = vmatpush3.bf16.msra.mxu0 (!%p1230_p3), %v1550_v13 }
 0x2cb   : > { %1552 = vmatprep.subr.bf16.mxu0 (!%p1230_p3), %v2026_v61 }
 0x2cc   : > { %v873_v52 = vadd.f32 %v872_v50, %v871_v49 }
 0x2ce   : > { %v874_v53 = vrot.slane %v873_v52, 2  ;;  %1554 = vmatpush3.bf16.msra.mxu0 (!%p1230_p3), %v1553_v16 }
 0x2cf   : > { %1555 = vmatprep.subr.bf16.mxu0 (!%p1230_p3), %v2026_v61 }
 0x2d0   : > { %v875_v56 = vadd.f32 %v874_v53, %v873_v52 }
 0x2d2   : > { %v876_v51 = vrot.slane %v875_v56, 1  ;;  %883 = sbr.rel (%p1230_p3) target bundleno = 953 (0x3b9), region = 72  ;;  %1557 = vmatpush3.bf16.msra.mxu0 (!%p1230_p3), %v1556_v19 }
 0x2d4   : > { %v877_v55 = vadd.f32 %v876_v51, %v875_v56 }
 0x2d6   : > { %v878_v57 = vadd.f32 %v877_v55, %v856_v54 }
 0x2d8   : > { %879 = vst [vmem:[#allocation2] sm:$0x1] %v878_v57 }
 0x2df   : > { %v884_v20 = vld [vmem:[#allocation2] sm:$0x1] }
 0x2e0   : > { %v885_v21 = vmul.f32 0.00390625, %v884_v20 }
 0x2e2   : > { %1468 = vmatmul.mubr.f32.vlgmr.msra.gmra.mrb[0].mxu0 %v885_v21 }
 0x3b5   : > { %v969_v23 = vpop.f32.mrb[0].mxu0 }
 0x3b6   : > { %v970_v24 = vadd.f32 %v969_v23, %v902_v22  ;;  %v1469_v25 = vpop.f32.mrb[1].mxu0 }
 0x3b8   : > { %973 = vst [vmem:[%s2462_s12] sm:$0x1] %v970_v24 }
 0x3b9 PF: > { %s2696_s7 = sld [smem:[#allocation22_spill]]  ;;  %s2697_s30 = sld [smem:[#allocation23_spill]] }
 0x3ba   : > { %s979_s26 = sand.u32 1, %s2138_s20   ;;  %s2698_s23 = sld [smem:[#allocation36_spill]] }
 0x3bb   : > { %s1017_s21 = sshll.u32 %s2435_s24, 4  ;;  %s2490_s20 = scalar_lea.sflag [#allocation13], %s979_s26  ;;  %s2488_s21 = int_to_ptr.vmem [resolvable:$true] %s1017_s21 }
 0x3bc   : > { %s1823_s5 = scalar_lea.vmem %s2488_s21, 2048 }
 0x3bd   : > { %p1824_p8 = scmp.ne.s32.totalorder %s2488_s21, %s1823_s5 }
 0x3bf   : > { %s1233_s3 = sshll.u32 %s2696_s7, 4  ;;  %s1234_s22 = sshll.u32 %s2697_s30, 5 }
 0x3c0   : > { %s2477_s27 = sadd.s32 %s1234_s22, %s1233_s3  ;;  %p1825_p13 = pnand %p1824_p8, %p2278_p9 }
 0x3c1   : > { %s1235_s9 = sshll.u32 %s2477_s27, 7  ;;  %s2029_s7 = smov [#allocation12]  }
 0x3c2   : > { %s2485_s15 = scalar_lea.hbm %s2698_s23, %s1235_s9  ;;  %p1826_p1 = pneg %p1825_p13 }
 0x3c3   : > { %s1827_s3 = sshll.u32 %s2029_s7, 4  ;;  %s1828_s3 = int_to_ptr.vmem [resolvable:$false] %s1827_s3 }
 0x3c4   : > { %s1829_s22 = scalar_lea.vmem %s1828_s3, 4096  ;;  %p1830_p2 = scmp.lt.s32.totalorder %s2488_s21, %s1828_s3 }
 0x3c5   : > { %p1831_p4 = scmp.lt.s32.totalorder %s1829_s22, %s1823_s5 }
 0x3c7   : > { %p1832_p10 = por %p1831_p4, %p1830_p2 }
 0x3c9   : > { %p1833_p6 = pnand %p1832_p10, %p1826_p1 }
 0x3cb   : > { %1836 = shalt.err (!%p1833_p6)
}
 0x3cc   : > { %s1837_s24 = scalar_lea.hbm %s2485_s15, 2048  ;;  %s1841_s29 = scalar_lea.hbm %s2698_s23, 8192 }
 0x3cd   : > { %p1838_p7 = scmp.ne.s32.totalorder %s2485_s15, %s1837_s24  ;;  %p1842_p11 = scmp.lt.u32.totalorder %s2485_s15, %s2698_s23 }
 0x3ce   : > { %p1843_p12 = scmp.lt.u32.totalorder %s1841_s29, %s1837_s24  ;;  %p1845_p8 = scmp.lt.u32.totalorder %s1837_s24, %s2485_s15 }
 0x3cf   : > { %p1839_p0 = pnand %p1838_p7, %p2278_p9 }
 0x3d0   : > { %p1844_p3 = por %p1843_p12, %p1842_p11 }
 0x3d1   : > { %p1840_p5 = pneg %p1839_p0 }
 0x3d2   : > { %p1846_p13 = por %p1845_p8, %p1844_p3 }
 0x3d4   : > { %p1847_p1 = pnand %p1846_p13, %p1840_p5 }
 0x3d6   : > { %1850 = shalt.err (!%p1847_p1)
}
 0x3d7   : > { %s2030_s5 = smov 128   ;;  %s2031_s22 = smov 8  }
 0x3d8   : > { %1573 = dma.vmem_to_hbm [thread:$0]  (%p2278_p9), %s2488_s21, 2048, %s2485_s15, %s2490_s20, %s2030_s5, %s2030_s5, %s2031_s22  }
 0x3d9   : > { %s2699_s28 = sld [smem:[#allocation35_spill]]  ;;  %s999_s7 = sshll.u32 %s2393_s8, 4  ;;  %s2525_s7 = int_to_ptr.vmem [resolvable:$true] %s999_s7 }
 0x3da   : > { %s1239_s3 = sshll.u32 %s2697_s30, 4  ;;  %s975_s0 = scalar_lea.sflag [#allocation5], %s2347_s25 }
 0x3db   : > { %s1851_s2 = scalar_lea.vmem %s2525_s7, 2048  ;;  %s2032_s15 = smov [#allocation11]  }
 0x3dc   : > { %p1852_p2 = scmp.ne.s32.totalorder %s2525_s7, %s1851_s2  ;;  %s1855_s27 = sshll.u32 %s2032_s15, 4  ;;  %s1856_s27 = int_to_ptr.vmem [resolvable:$false] %s1855_s27 }
 0x3dd   : > { %s1857_s21 = scalar_lea.vmem %s1856_s27, 4096  ;;  %p1858_p6 = scmp.lt.s32.totalorder %s2525_s7, %s1856_s27 }
 0x3de   : > { %p1853_p4 = pnand %p1852_p2, %p2278_p9  ;;  %p1859_p7 = scmp.lt.s32.totalorder %s1857_s21, %s1851_s2 }
 0x3df   : > { %s2522_s29 = scalar_lea.hbm %s2699_s28, %s1235_s9 }
 0x3e0   : > { %p1854_p10 = pneg %p1853_p4  ;;  %p1860_p0 = por %p1859_p7, %p1858_p6 }
 0x3e2   : > { %p1861_p5 = pnand %p1860_p0, %p1854_p10 }
 0x3e4   : > { %1864 = shalt.err (!%p1861_p5)
}
 0x3e5   : > { %s1865_s8 = scalar_lea.hbm %s2522_s29, 2048  ;;  %s1869_s26 = scalar_lea.hbm %s2699_s28, 8192 }
 0x3e6   : > { %p1866_p11 = scmp.ne.s32.totalorder %s2522_s29, %s1865_s8  ;;  %p1870_p8 = scmp.lt.u32.totalorder %s2522_s29, %s2699_s28 }
 0x3e7   : > { %p1871_p13 = scmp.lt.u32.totalorder %s1869_s26, %s1865_s8  ;;  %p1873_p2 = scmp.lt.u32.totalorder %s1865_s8, %s2522_s29 }
 0x3e8   : > { %p1867_p12 = pnand %p1866_p11, %p2278_p9 }
 0x3e9   : > { %p1872_p1 = por %p1871_p13, %p1870_p8 }
 0x3ea   : > { %p1868_p3 = pneg %p1867_p12 }
 0x3eb   : > { %p1874_p4 = por %p1873_p2, %p1872_p1 }
 0x3ed   : > { %p1875_p10 = pnand %p1874_p4, %p1868_p3 }
 0x3ef   : > { %1878 = shalt.err (!%p1875_p10)
}
 0x3f0   : > { %s2700_s2 = sld [smem:[#allocation25_spill]]  ;;  %s2701_s8 = sld [smem:[#allocation37_spill]] }
 0x3f1   : > { %1572 = dma.vmem_to_hbm [thread:$0]  (%p2278_p9), %s2525_s7, 2048, %s2522_s29, %s975_s0, %s2030_s5, %s2030_s5, %s2031_s22  }
 0x3f2   : > { %s1033_s26 = sshll.u32 %s2462_s12, 4  ;;  %s2033_s25 = smov [#allocation14]   ;;  %s1034_s26 = int_to_ptr.vmem [resolvable:$true] %s1033_s26 }
 0x3f3   : > { %s1879_s16 = scalar_lea.vmem %s1034_s26, 16  ;;  %s1883_s15 = sshll.u32 %s2033_s25, 4  ;;  %s1884_s15 = int_to_ptr.vmem [resolvable:$false] %s1883_s15 }
 0x3f4   : > { %p1880_p6 = scmp.ne.s32.totalorder %s1034_s26, %s1879_s16  ;;  %s1885_s27 = scalar_lea.vmem %s1884_s15, 32 }
 0x3f5   : > { %p1886_p11 = scmp.lt.s32.totalorder %s1034_s26, %s1884_s15  ;;  %p1887_p12 = scmp.lt.s32.totalorder %s1885_s27, %s1879_s16 }
 0x3f6   : > { %s2560_s24 = scalar_lea.hbm %s2701_s8, %s1239_s3  ;;  %p2702_p7 = scmp.ne.s32.totalorder %s2700_s2, 0 }
 0x3f7   : > { %p1888_p9 = por %p1887_p12, %p1886_p11 }
 0x3f8   : > { %p1881_p0 = pnand %p1880_p6, %p2702_p7 }
 0x3fa   : > { %p1882_p5 = pneg %p1881_p0 }
 0x3fc   : > { %p1889_p3 = pnand %p1888_p9, %p1882_p5 }
 0x3fe   : > { %1892 = shalt.err (!%p1889_p3)
}
 0x3ff   : > { %s1893_s0 = scalar_lea.hbm %s2560_s24, 16  ;;  %s1897_s5 = scalar_lea.hbm %s2701_s8, 32 }
 0x400   : > { %p1894_p8 = scmp.ne.s32.totalorder %s2560_s24, %s1893_s0  ;;  %p1898_p2 = scmp.lt.u32.totalorder %s2560_s24, %s2701_s8 }
 0x401   : > { %p1899_p4 = scmp.lt.u32.totalorder %s1897_s5, %s1893_s0  ;;  %p1901_p6 = scmp.lt.u32.totalorder %s1893_s0, %s2560_s24 }
 0x402   : > { %p1895_p13 = pnand %p1894_p8, %p2702_p7 }
 0x403   : > { %p1900_p10 = por %p1899_p4, %p1898_p2 }
 0x404   : > { %p1896_p1 = pneg %p1895_p13 }
 0x405   : > { %p1902_p0 = por %p1901_p6, %p1900_p10 }
 0x407   : > { %p1903_p5 = pnand %p1902_p0, %p1896_p1 }
 0x409   : > { %1906 = shalt.err (!%p1903_p5)
}
 0x40a   : > { %1574 = dma.vmem_to_hbm [thread:$0]  (%p2702_p7), %s1034_s26, 16, %s2560_s24, %s2490_s20  }
 0x40b PF: > { %s2703_s7 = sld [smem:[#allocation21_spill]]  ;;  %s2704_s3 = sld [smem:[#allocation24_spill]] }
 0x40c   : > { %p1609_p11 = scmp.ge.s32.totalorder %s2017_s19, 2 }
 0x411   : > { %s1045_s21 = sand.u32 1, %s2703_s7   ;;  %p2705_p12 = scmp.ne.s32.totalorder %s2704_s3, 0 }
 0x412   : > { %s1046_s9 = scalar_lea.sflag [#allocation5], %s1045_s21 }
 0x413   : > { %p1593_p9 = pnand %p1609_p11, %p2705_p12 }
 0x415   : > { %1964 = dma.done.wait (!%p1593_p9), %s1046_s9, 2048  }
 0x416   : > { %1966 = vsyncadd (!%p1593_p9), %s1046_s9, 4294965248  ;;  %s2706_s16 = sadd.s32 4294967294, %s2017_s19  }
 0x417   : > { %s1054_s25 = sand.u32 1, %s2706_s16  }
 0x418   : > { %s1055_s15 = scalar_lea.sflag [#allocation13], %s1054_s25 }
 0x419   : > { %1968 = dma.done.wait (!%p1593_p9), %s1055_s15, 2048  }
 0x41a   : > { %1970 = vsyncadd (!%p1593_p9), %s1055_s15, 4294965248  ;;  %s2707_s2 = sld [smem:[#allocation26_spill]] }
 0x420   : > { %p2708_p3 = scmp.ne.s32.totalorder %s2707_s2, 0 }
 0x422   : > { %p1599_p7 = pnand %p1609_p11, %p2708_p3 }
 0x424   : > { %1972 = dma.done.wait (!%p1599_p7), %s1055_s15, 16  }
 0x425   : > { %1974 = vsyncadd (!%p1599_p7), %s1055_s15, 4294967280  ;;  %s31_s19 = sadd.s32 1, %s2017_s19   ;;  %s2709_s20 = sld [smem:[#allocation27_spill]] }
 0x426   : > { %p28_p8 = scmp.ge.s32.totalorder %s31_s19, 6   ;;  %s2710_s24 = sld [smem:[#allocation28_spill]] }
 0x427   : > { %s2711_s30 = smov %s1981_s10  ;;  %s2712_s10 = smov %s1985_s11 }
 0x428   : > { %s2713_s11 = smov %s2292_s1  ;;  %s2714_s12 = smov %s1993_s13 }
 0x429   : > { %s2715_s13 = smov %s1997_s14  ;;  %s2716_s14 = smov %s2295_s6 }
 0x42a   : > { %s2717_s15 = smov %s2009_s17  ;;  %s2718_s16 = smov %s2013_s18 }
 0x42b   : > { %s2719_s17 = smov %s2709_s20  ;;  %30 = sbr.rel (!%p28_p8) target bundleno = 23 (0x17), region = 145 }
 0x42c   : > { %s2720_s18 = smov %s2710_s24 }
 0x432   :  { %1068 = vsyncpa [#allocation4], 1 }
 0x433   :  { %1070 = vsyncpa [#allocation4 + $0x1], 1 }
 0x434   :  { %1071 = vsyncpa [#allocation7], 1 }
 0x435   :  { %1072 = vsyncpa [#allocation10], 1 }
 0x436   :  { %1073 = vsyncpa [#allocation5], 1 }
 0x437   :  { %1075 = vsyncpa [#allocation5 + $0x1], 1 }
 0x438   :  { %1076 = vsyncpa [#allocation13], 1 }
 0x439   :  { %1078 = vsyncpa [#allocation13 + $0x1], 1 }

</bundles_post_ra>
